<compile_context>
chip_gen: v7x
topology: tpu7x:2x2x1
jax: 0.10.0
libtpu: 0.0.40
codegen_flags: <defaults>
</compile_context>

<pallas_src>
import functools

import jax
import jax.numpy as jnp
from jax.experimental import pallas as pl
from jax.experimental.pallas import tpu as pltpu


def _round_up(x, m):
    return ((x + m - 1) // m) * m


def _vq_argmin_kernel(x_ref, emb_t_ref, e2h_ref, idx_ref):
    """One N-tile: nearest-codebook-row index for each input row.

    x_ref     : (TN, D)   input rows (logical D, no padding)
    emb_t_ref : (D, Kp)   codebook transposed; K lane-padded
    e2h_ref   : (1, Kp)   0.5*||e_k||^2 (padded columns hold +1e30)
    idx_ref   : (TN, 1)   int32 nearest-code indices
    """
    w = emb_t_ref[...]
    x = x_ref[...].astype(w.dtype)        # optional bf16 distance matmul

    # argmin_k ||x - e_k||^2  ==  argmax_k ( <x, e_k> - 0.5*||e_k||^2 )
    dots = jnp.dot(x, w, preferred_element_type=jnp.float32)     # (TN, Kp) MXU
    score = dots - e2h_ref[...]                                  # (TN, Kp) VPU

    tn, kp = score.shape
    best = jnp.max(score, axis=1, keepdims=True)                 # (TN, 1)
    k_iota = jax.lax.broadcasted_iota(jnp.int32, (tn, kp), 1)
    # First-index tie-break (matches torch.argmin).
    idx = jnp.min(jnp.where(score == best, k_iota, kp), axis=1, keepdims=True)
    idx_ref[...] = idx.astype(jnp.int32)


def _vmem_budgets():
    """(per-step tile VMEM budget, scoped vmem limit), generation-aware."""
    cap = None
    try:
        cap = int(getattr(pltpu.get_tpu_info(), "vmem_capacity_bytes", 0)) or None
    except Exception:  # query unavailable -> be conservative (v7x-safe)
        cap = None
    if cap is not None and cap >= 128 * 1024 * 1024:   # v5e / v6e (128 MiB)
        return 64 * 1024 * 1024, 100 * 1024 * 1024
    return 20 * 1024 * 1024, 48 * 1024 * 1024          # v7x (64 MiB) / unknown


def vector_quantizer_forward(inputs_nchw, embedding, commitment_cost, *,
                             distance_dtype=None, max_tile_n=4096):
    """VQ-VAE VectorQuantizer forward (values match the PyTorch module).

    inputs_nchw: (B, C, H, W) float32, C == embedding_dim
    embedding:   (num_embeddings, embedding_dim) float32
    Returns (loss, quantized_nchw, perplexity, encodings).
    """
    b, c, h, w = inputs_nchw.shape
    k, d = embedding.shape
    assert c == d

    # NCHW -> NHWC -> (N, D).
    # TODO(synk): accept NHWC activations directly to drop these two full
    # HBM transpose passes when the surrounding model allows it.
    inputs_nhwc = jnp.transpose(inputs_nchw, (0, 2, 3, 1))
    x_flat = inputs_nhwc.reshape(-1, d).astype(jnp.float32)
    n = x_flat.shape[0]

    # Codebook prep (tiny: K x D).  Lane-pad K; padded columns get a huge
    # 0.5*||e||^2 so they can never win the argmax.
    kp = _round_up(k, 128)
    w_dtype = jnp.float32 if distance_dtype is None else distance_dtype
    emb_f32 = embedding.astype(jnp.float32)
    emb_t = jnp.pad(emb_f32, ((0, kp - k), (0, 0))).T.astype(w_dtype)  # (D, Kp)
    e2h = 0.5 * jnp.sum(emb_f32 * emb_f32, axis=1)
    e2h = jnp.concatenate(
        [e2h, jnp.full((kp - k,), 1e30, jnp.float32)]).reshape(1, kp)

    # ---- tile_n sizing: double-buffered blocks + in-kernel temporaries ----
    tile_budget, vmem_limit = _vmem_budgets()
    w_bytes = 2 if w_dtype == jnp.bfloat16 else 4
    per_row = (2 * d * 4          # x block (double-buffered)
               + 2 * 128 * 4      # idx block (lane-padded in VMEM, dbl-buffered)
               + 4 * kp * 4)      # dots/score/iota/select live temporaries
    fixed = 2 * (d * kp * w_bytes + kp * 4)   # codebook^T + ||e||^2 blocks
    # (For very large codebooks these grid-constant blocks could be pinned to
    #  a single buffer with pipeline_mode=pl.Buffered(1) to halve `fixed`.)
    tile_n = max(8, (tile_budget - fixed) // per_row)
    tile_n = min(tile_n, max_tile_n, _round_up(n, 8))
    # Keep >= 2 grid steps so the "parallel" axis shards across v7x's two
    # TensorCores and block DMAs overlap compute on single-core chips.
    if tile_n >= n and n > 8:
        tile_n = _round_up((n + 1) // 2, 8)
    tile_n = max(8, (tile_n // 8) * 8)
    num_tiles = -(-n // tile_n)               # ragged last tile is masked

    idx_out = pl.pallas_call(
        _vq_argmin_kernel,
        out_shape=jax.ShapeDtypeStruct((n, 1), jnp.int32),
        grid_spec=pltpu.PrefetchScalarGridSpec(
            num_scalar_prefetch=0,
            grid=(num_tiles,),
            in_specs=[
                pl.BlockSpec((tile_n, d), lambda i: (i, 0)),  # x rows
                pl.BlockSpec((d, kp), lambda i: (0, 0)),      # codebook^T (const)
                pl.BlockSpec((1, kp), lambda i: (0, 0)),      # 0.5*||e||^2 (const)
            ],
            out_specs=pl.BlockSpec((tile_n, 1), lambda i: (i, 0)),
        ),
        compiler_params=pltpu.CompilerParams(
            dimension_semantics=("parallel",),
            vmem_limit_bytes=vmem_limit,
        ),
    )(x_flat, emb_t, e2h)

    # ---- cheap XLA glue on the indices ------------------------------------
    indices = idx_out[:, 0]                                     # (N,)
    encodings = jax.nn.one_hot(indices, k, dtype=jnp.float32)   # (N, K)
    quantized_flat = jnp.take(emb_f32, indices, axis=0)         # exact rows

    # q_latent_loss and e_latent_loss have identical forward values.
    mse = jnp.mean((quantized_flat - x_flat) ** 2)
    loss = (1.0 + commitment_cost) * mse

    avg_probs = jnp.mean(encodings, axis=0)
    perplexity = jnp.exp(-jnp.sum(avg_probs * jnp.log(avg_probs + 1e-10)))

    # Straight-through estimator (forward value only).
    quantized_st = x_flat + (quantized_flat - x_flat)
    quantized_nchw = jnp.transpose(
        quantized_st.reshape(b, h, w, d), (0, 3, 1, 2))
    return loss, quantized_nchw, perplexity, encodings


def _reference_forward(inputs_nchw, embedding, commitment_cost):
    """Pure-JAX mirror of the PyTorch module (forward values)."""
    k, d = embedding.shape
    inputs = jnp.transpose(inputs_nchw, (0, 2, 3, 1))
    flat = inputs.reshape(-1, d)
    dist = (jnp.sum(flat ** 2, axis=1, keepdims=True)
            + jnp.sum(embedding ** 2, axis=1)
            - 2.0 * flat @ embedding.T)
    idx = jnp.argmin(dist, axis=1)
    enc = jax.nn.one_hot(idx, k, dtype=jnp.float32)
    q = (enc @ embedding).reshape(inputs.shape)
    mse = jnp.mean((q - inputs) ** 2)
    loss = (1.0 + commitment_cost) * mse
    avg_probs = jnp.mean(enc, axis=0)
    perplexity = jnp.exp(-jnp.sum(avg_probs * jnp.log(avg_probs + 1e-10)))
    q_st = inputs + (q - inputs)
    return loss, jnp.transpose(q_st, (0, 3, 1, 2)), perplexity, enc


if __name__ == "__main__":
    num_embeddings = 16
    embedding_dim = 8
    commitment_cost = 0.25

    key = jax.random.PRNGKey(0)
    k_emb, k_x = jax.random.split(key)
    # nn.Embedding weight ~ U(-1/K, 1/K), as in the module's __init__.
    embedding = jax.random.uniform(
        k_emb, (num_embeddings, embedding_dim), dtype=jnp.float32,
        minval=-1.0 / num_embeddings, maxval=1.0 / num_embeddings)
    # Input in NCHW with C == embedding_dim.
    x = jax.random.normal(k_x, (2, embedding_dim, 8, 8), dtype=jnp.float32)

    fwd = jax.jit(functools.partial(
        vector_quantizer_forward, commitment_cost=commitment_cost))
    loss, quantized, perplexity, encodings = fwd(x, embedding)
    jax.block_until_ready((loss, quantized, perplexity, encodings))

    # Sanity check against the pure-JAX reference.
    r_loss, r_q, r_ppl, r_enc = _reference_forward(x, embedding, commitment_cost)
    assert quantized.shape == x.shape
    assert encodings.shape == (2 * 8 * 8, num_embeddings)
    assert jnp.allclose(loss, r_loss, atol=1e-5)
    assert jnp.allclose(quantized, r_q, atol=1e-5)
    assert jnp.allclose(perplexity, r_ppl, atol=1e-4)
    assert jnp.allclose(encodings, r_enc)

    print("KERNEL_OK")
</pallas_src>

<mosaic_0001>
module attributes {stable_mosaic.version = 11 : i64} {
  func.func @_vq_argmin_kernel(%arg0: i32, %arg1: memref<64x8xf32, #tpu.memory_space<vmem>>, %arg2: memref<8x128xf32, #tpu.memory_space<vmem>>, %arg3: memref<1x128xf32, #tpu.memory_space<vmem>>, %arg4: memref<64x1xi32, #tpu.memory_space<vmem>>) attributes {dimension_semantics = [#tpu.dimension_semantics<parallel>], iteration_bounds = array<i64: 2>, scalar_prefetch = 0 : i64, scratch_operands = 0 : i64, tpu.core_type = #tpu.core_type<tc>, window_params = [{transform_indices = @transform_0, window_bounds = array<i64: 64, 8>}, {pipeline_mode = #tpu.pipeline_mode<synchronous>, transform_indices = @transform_1, window_bounds = array<i64: 8, 128>}, {pipeline_mode = #tpu.pipeline_mode<synchronous>, transform_indices = @transform_2, window_bounds = array<i64: 1, 128>}, {transform_indices = @transform_3, window_bounds = array<i64: 64, 1>}]} {
    %c0 = arith.constant 0 : index
    %c0_0 = arith.constant 0 : index
    %0 = vector.load %arg2[%c0, %c0_0] : memref<8x128xf32, #tpu.memory_space<vmem>>, vector<8x128xf32>
    %c0_1 = arith.constant 0 : index
    %c0_2 = arith.constant 0 : index
    %1 = vector.load %arg1[%c0_1, %c0_2] : memref<64x8xf32, #tpu.memory_space<vmem>>, vector<64x8xf32>
    %cst = arith.constant dense<0.000000e+00> : vector<64x128xf32>
    %2 = tpu.matmul %1, %0, %cst {dimension_numbers = #tpu.dot_dimension_numbers<[1], [0], [0], [1], [0, 0, 1, 1], [], []>} : vector<64x8xf32>, vector<8x128xf32>, vector<64x128xf32> -> vector<64x128xf32>
    %c0_3 = arith.constant 0 : index
    %c0_4 = arith.constant 0 : index
    %3 = vector.load %arg3[%c0_3, %c0_4] : memref<1x128xf32, #tpu.memory_space<vmem>>, vector<1x128xf32>
    %4 = vector.broadcast %3 : vector<1x128xf32> to vector<64x128xf32>
    %5 = arith.subf %2, %4 : vector<64x128xf32>
    %cst_5 = arith.constant dense<0xFF800000> : vector<64xf32>
    %6 = vector.multi_reduction <maximumf>, %5, %cst_5 [1] : vector<64x128xf32> to vector<64xf32>
    %7 = vector.shape_cast %6 : vector<64xf32> to vector<64x1xf32>
    %8 = tpu.iota {dimensions = array<i32: 1>} : vector<64x128xi32>
    %9 = vector.broadcast %7 : vector<64x1xf32> to vector<64x128xf32>
    %10 = arith.cmpf oeq, %5, %9 : vector<64x128xf32>
    %c128_i32 = arith.constant 128 : i32
    %11 = vector.broadcast %c128_i32 : i32 to vector<64x128xi32>
    %12 = arith.select %10, %8, %11 : vector<64x128xi1>, vector<64x128xi32>
    %cst_6 = arith.constant dense<2147483647> : vector<64xi32>
    %13 = vector.multi_reduction <minsi>, %12, %cst_6 [1] : vector<64x128xi32> to vector<64xi32>
    %14 = vector.shape_cast %13 : vector<64xi32> to vector<64x1xi32>
    %c0_7 = arith.constant 0 : index
    %c0_8 = arith.constant 0 : index
    %15 = vector.load %arg4[%c0_7, %c0_8] : memref<64x1xi32, #tpu.memory_space<vmem>>, vector<64x1xi32>
    tpu.vector_store %arg4[%c0_7, %c0_8], %14 {strides = array<i32>} : memref<64x1xi32, #tpu.memory_space<vmem>>, vector<64x1xi32>,
    return
  }
  func.func @transform_0(%arg0: i32) -> (i32, i32) {
    %c0_i32 = arith.constant 0 : i32
    %c0_i32_0 = arith.constant 0 : i32
    return %arg0, %c0_i32 : i32, i32
  }
  func.func @transform_1(%arg0: i32) -> (i32, i32) {
    %c0_i32 = arith.constant 0 : i32
    %c0_i32_0 = arith.constant 0 : i32
    %c0_i32_1 = arith.constant 0 : i32
    return %c0_i32, %c0_i32_0 : i32, i32
  }
  func.func @transform_2(%arg0: i32) -> (i32, i32) {
    %c0_i32 = arith.constant 0 : i32
    %c0_i32_0 = arith.constant 0 : i32
    %c0_i32_1 = arith.constant 0 : i32
    return %c0_i32, %c0_i32_0 : i32, i32
  }
  func.func @transform_3(%arg0: i32) -> (i32, i32) {
    %c0_i32 = arith.constant 0 : i32
    %c0_i32_0 = arith.constant 0 : i32
    return %arg0, %c0_i32 : i32, i32
  }
}

</mosaic_0001>

<bundles_post_ra>
// kernel: vector_quantizer_forward.1
= control target key start
LH: loop header
LB: loop body
LE: loop exit
PB: predicated region body
PF: predicated region fallthrough
CT: control target
= control target key end

     0   :  { %s620_s12 = smov 0   ;;  %s676_s0 = inlined_call_operand.vmem [shape: f32[128,8], index: 0, kind: input, shape index: {}]   ;;  %s677_s1 = inlined_call_operand.vmem [shape: f32[8,128], index: 1, kind: input, shape index: {}]   ;;  %s678_s2 = inlined_call_operand.vmem [shape: f32[1,128], index: 2, kind: input, shape index: {}]   ;;  %s679_s3 = inlined_call_operand.vmem [shape: s32[128,1], index: 3, kind: output, shape index: {}]  }
   0x1 LB: > { %s539_s13 = sadd.s32 4294967295, %s598_s12   ;;  %p543_p0 = scmp.ge.s32.totalorder %s598_s12, 1  ;;  %s598_s12 = sphi %s620_s12, %s13_s12  }
   0x2   : > { %p138_p1 = scmp.lt.s32.totalorder %s598_s12, 3 }
   0x4   : > { %p139_p2 = pnand %p543_p0, %p138_p1 }
   0x5   : > { %v174_v0 = vld [vmem:[%s677_s1] sm:$0xff] (!%p139_p2)  ;;  %s544_s16 = sshll.u32 (!%p139_p2), %s539_s13, 3  ;;  %vm183_vm0 = vcmask (!%p139_p2), 64512   ;;  %v344_v26 = vlaneseq (!%p139_p2) }
   0x6   : > { %142 = sbr.rel (%p139_p2) target bundleno = 687 (0x2af), region = 32  ;;  %568 = vmatprep.subr.mxu0 (!%p139_p2), %v174_v0  ;;  %582 = vmatprep.subr.mxu1 (!%p139_p2), %v174_v0  ;;  %p163_p3 = scmp.lt.s32.totalorder (!%p139_p2), %s544_s16, 15  ;;  %v556_v9 = vld [vmem:[%s678_s2] ss:$0 sm:$0xff] (!%p139_p2) }
   0x7   : > { %569 = vmatpush3.msra.mxu0 (!%p139_p2), %v174_v0  ;;  %583 = vmatpush3.msra.mxu1 (!%p139_p2), %v174_v0  ;;  %v345_v27 = vand.u32 (!%p139_p2), 127, %v344_v26 }
   0xd   : > { %s681_s16 = smov (!%p163_p3, %s544_s16), 15 }
   0xe   : > { %s545_s17 = sshll.u32 %s681_s16, 3 }
   0xf   : > { %s166_s20 = scalar_lea.vmem %s676_s0, %s545_s17  ;;  %s655_s25 = scalar_lea.vmem %s679_s3, %s545_s17 }
  0x10   : > { %v175_v1 = vld [vmem:[%s166_s20] sm:$0xff]  ;;  %v176_v3 = vld [vmem:[%s166_s20 + $0x8] sm:$0xff]  ;;  %v177_v5 = vld [vmem:[%s166_s20 + $0x10] sm:$0xff] }
  0x11   : > { %v179_v2 = vld [vmem:[%s166_s20 + $0x20] sm:$0xff]  ;;  %570 = vmatprep.mubr.msk.f32.mxu0 %vm183_vm0, %v175_v1  ;;  %v180_v4 = vld [vmem:[%s166_s20 + $0x28] sm:$0xff]  ;;  %v181_v6 = vld [vmem:[%s166_s20 + $0x30] sm:$0xff] }
  0x12   : > { %576 = vmatprep.mubr.msk.f32.mxu1 %vm183_vm0, %v179_v2  ;;  %571 = vmatmul.mubr.msk.f32.vlgmr.msra.gmra.mrb[0].mxu0 %vm183_vm0, %v176_v3  ;;  %v178_v7 = vld [vmem:[%s166_s20 + $0x18] sm:$0xff] }
  0x13   : > { %577 = vmatmul.mubr.msk.f32.vlgmr.msra.gmra.mrb[0].mxu1 %vm183_vm0, %v180_v4  ;;  %573 = vmatprep.mubr.msk.f32.mxu0 %vm183_vm0, %v177_v5  ;;  %v182_v8 = vld [vmem:[%s166_s20 + $0x38] sm:$0xff] }
  0x14   : > { %579 = vmatprep.mubr.msk.f32.mxu1 %vm183_vm0, %v181_v6 }
  0x16   : > { %574 = vmatmul.mubr.msk.f32.gmra.mrb[2].mxu0 %vm183_vm0, %v178_v7 }
  0x17   : > { %580 = vmatmul.mubr.msk.f32.gmra.mrb[2].mxu1 %vm183_vm0, %v182_v8 }
  0xe5   : > { %v572_v10 = vpop.f32.mrb[0].mxu0 }
  0xe6   : > { %v578_v11 = vpop.f32.mrb[0].mxu1  ;;  %v321_v12 = vsub.f32 %v572_v10, %v556_v9  ;;  %v274_v14 = vpop.f32.mrb[1].mxu0 }
  0xe7   : > { %v325_v13 = vsub.f32 %v578_v11, %v556_v9  ;;  %v294_v15 = vpop.f32.mrb[1].mxu1  ;;  %v320_v18 = vsub.f32 %v274_v14, %v556_v9 }
  0xe8   : > { %330 = vmax.xlane.f32.xlu0 %v321_v12  ;;  %v324_v23 = vsub.f32 %v294_v15, %v556_v9 }
  0xe9   : > { %338 = vmax.xlane.f32.xlu1 %v325_v13  ;;  %v575_v16 = vpop.f32.mrb[2].mxu0 }
  0xea   : > { %v581_v17 = vpop.f32.mrb[2].mxu1  ;;  %v323_v19 = vsub.f32 %v575_v16, %v556_v9  ;;  %v284_v20 = vpop.f32.mrb[3].mxu0 }
  0xeb   : > { %v304_v21 = vpop.f32.mrb[3].mxu1  ;;  %v322_v22 = vsub.f32 %v284_v20, %v556_v9  ;;  %v327_v24 = vsub.f32 %v581_v17, %v556_v9 }
  0xec   : > { %328 = vmax.xlane.f32.xlu0 %v320_v18  ;;  %v326_v25 = vsub.f32 %v304_v21, %v556_v9 }
  0xed   : > { %334 = vmax.xlane.f32.xlu1 %v323_v19 }
  0xf0   : > { %336 = vmax.xlane.f32.xlu0 %v324_v23 }
  0xf1   : > { %332 = vmax.xlane.f32.xlu1 %v322_v22 }
  0xf4   : > { %340 = vmax.xlane.f32.xlu0 %v326_v25 }
  0xf5   : > { %342 = vmax.xlane.f32.xlu1 %v327_v24 }
 0x175   : > { %v331_v29 = vpop.xlane.xlu0 %330 }
 0x176   : > { %v339_v28 = vpop.xlane.xlu1 %338  ;;  %vm347_vm2 = vcmp.eq.f32.partialorder %v321_v12, %v331_v29 }
 0x177   : > { %vm351_vm1 = vcmp.eq.f32.partialorder %v325_v13, %v339_v28  ;;  %v355_v31 = vsel %vm347_vm2, %v345_v27, 128 }
 0x178   : > { %v359_v30 = vsel %vm351_vm1, %v345_v27, 128  ;;  %v377_v32 = vshra.s32 %v355_v31, 16  ;;  %v376_v60 = vand.u32 65535, %v355_v31  ;;  %vm474_vm1 = vcmask 7168  }
 0x179   : > { %v329_v33 = vpop.xlane.xlu0 %328  ;;  %v433_v36 = vshra.s32 %v359_v30, 16  ;;  %v432_v61 = vand.u32 65535, %v359_v30 }
 0x17a   : > { %v335_v34 = vpop.xlane.xlu1 %334  ;;  %vm346_vm3 = vcmp.eq.f32.partialorder %v320_v18, %v329_v33  ;;  %v379_v35 = vcvt.s32.f32 %v377_v32  ;;  %v378_v0 = vcvt.s32.f32 %v376_v60 }
 0x17b   : > { %vm349_vm4 = vcmp.eq.f32.partialorder %v323_v19, %v335_v34  ;;  %v354_v37 = vsel %vm346_vm3, %v345_v27, 128  ;;  %v435_v44 = vcvt.s32.f32 %v433_v36  ;;  %v434_v7 = vcvt.s32.f32 %v432_v61 }
 0x17c   : > { %v357_v38 = vsel %vm349_vm4, %v345_v27, 128  ;;  %380 = vmin.xlane.f32.xlu1 %v379_v35  ;;  %v363_v39 = vshra.s32 %v354_v37, 16  ;;  %v362_v62 = vand.u32 65535, %v354_v37 }
 0x17d   : > { %v337_v40 = vpop.xlane.xlu0 %336  ;;  %v405_v42 = vshra.s32 %v357_v38, 16  ;;  %v404_v2 = vand.u32 65535, %v357_v38 }
 0x17e   : > { %v333_v41 = vpop.xlane.xlu1 %332  ;;  %vm350_vm5 = vcmp.eq.f32.partialorder %v324_v23, %v337_v40  ;;  %v365_v43 = vcvt.s32.f32 %v363_v39  ;;  %v364_v6 = vcvt.s32.f32 %v362_v62 }
 0x17f   : > { %vm348_vm6 = vcmp.eq.f32.partialorder %v322_v22, %v333_v41  ;;  %v358_v45 = vsel %vm350_vm5, %v345_v27, 128  ;;  %v407_v50 = vcvt.s32.f32 %v405_v42  ;;  %v406_v15 = vcvt.s32.f32 %v404_v2 }
 0x180   : > { %v356_v46 = vsel %vm348_vm6, %v345_v27, 128  ;;  %366 = vmin.xlane.f32.xlu0 %v365_v43  ;;  %436 = vmin.xlane.f32.xlu1 %v435_v44  ;;  %v419_v47 = vshra.s32 %v358_v45, 16  ;;  %v418_v3 = vand.u32 65535, %v358_v45 }
 0x181   : > { %v341_v48 = vpop.xlane.xlu0 %340  ;;  %v391_v52 = vshra.s32 %v356_v46, 16  ;;  %v390_v10 = vand.u32 65535, %v356_v46 }
 0x182   : > { %v343_v49 = vpop.xlane.xlu1 %342  ;;  %vm352_vm7 = vcmp.eq.f32.partialorder %v326_v25, %v341_v48  ;;  %v421_v51 = vcvt.s32.f32 %v419_v47  ;;  %v420_v14 = vcvt.s32.f32 %v418_v3 }
 0x183   : > { %vm353_vm8 = vcmp.eq.f32.partialorder %v327_v24, %v343_v49  ;;  %v360_v53 = vsel %vm352_vm7, %v345_v27, 128  ;;  %v393_v56 = vcvt.s32.f32 %v391_v52  ;;  %v392_v21 = vcvt.s32.f32 %v390_v10 }
 0x184   : > { %v361_v54 = vsel %vm353_vm8, %v345_v27, 128  ;;  %422 = vmin.xlane.f32.xlu0 %v421_v51  ;;  %408 = vmin.xlane.f32.xlu1 %v407_v50  ;;  %v447_v58 = vshra.s32 %v360_v53, 16  ;;  %v446_v18 = vand.u32 65535, %v360_v53 }
 0x185   : > { %v461_v55 = vshra.s32 %v361_v54, 16  ;;  %v460_v11 = vand.u32 65535, %v361_v54 }
 0x186   : > { %v449_v59 = vcvt.s32.f32 %v447_v58  ;;  %v448_v26 = vcvt.s32.f32 %v446_v18 }
 0x187   : > { %v463_v57 = vcvt.s32.f32 %v461_v55  ;;  %v462_v22 = vcvt.s32.f32 %v460_v11 }
 0x188   : > { %394 = vmin.xlane.f32.xlu0 %v393_v56 }
 0x189   : > { %464 = vmin.xlane.f32.xlu1 %v463_v57 }
 0x18c   : > { %450 = vmin.xlane.f32.xlu0 %v449_v59 }
 0x209   : > { %v381_v63 = vpop.xlane.xlu1 %380 }
 0x20a   : > { %vm382_vm9 = vcmp.eq.f32.partialorder %v379_v35, %v381_v63  ;;  %v387_v28 = vcvt.f32.s32 %v381_v63 }
 0x20b   : > { %v383_v1 = vsel %vm382_vm9, %v378_v0, inf }
 0x20c   : > { %384 = vmin.xlane.f32.xlu1 %v383_v1  ;;  %v388_v31 = vshll.u32 %v387_v28, 16 }
 0x20d   : > { %v367_v4 = vpop.xlane.xlu0 %366  ;;  %v437_v5 = vpop.xlane.xlu1 %436 }
 0x20e   : > { %vm368_vm10 = vcmp.eq.f32.partialorder %v365_v43, %v367_v4  ;;  %vm438_vm11 = vcmp.eq.f32.partialorder %v435_v44, %v437_v5  ;;  %v373_v29 = vcvt.f32.s32 %v367_v4  ;;  %v443_v32 = vcvt.f32.s32 %v437_v5 }
 0x20f   : > { %v369_v8 = vsel %vm368_vm10, %v364_v6, inf  ;;  %v439_v9 = vsel %vm438_vm11, %v434_v7, inf }
 0x210   : > { %370 = vmin.xlane.f32.xlu0 %v369_v8  ;;  %440 = vmin.xlane.f32.xlu1 %v439_v9  ;;  %v374_v35 = vshll.u32 %v373_v29, 16  ;;  %v444_v39 = vshll.u32 %v443_v32, 16 }
 0x211   : > { %v423_v12 = vpop.xlane.xlu0 %422  ;;  %v409_v13 = vpop.xlane.xlu1 %408 }
 0x212   : > { %vm424_vm12 = vcmp.eq.f32.partialorder %v421_v51, %v423_v12  ;;  %vm410_vm13 = vcmp.eq.f32.partialorder %v407_v50, %v409_v13  ;;  %v429_v36 = vcvt.f32.s32 %v423_v12  ;;  %v415_v40 = vcvt.f32.s32 %v409_v13 }
 0x213   : > { %v425_v16 = vsel %vm424_vm12, %v420_v14, inf  ;;  %v411_v17 = vsel %vm410_vm13, %v406_v15, inf }
 0x214   : > { %426 = vmin.xlane.f32.xlu0 %v425_v16  ;;  %412 = vmin.xlane.f32.xlu1 %v411_v17  ;;  %v430_v45 = vshll.u32 %v429_v36, 16  ;;  %v416_v49 = vshll.u32 %v415_v40, 16 }
 0x215   : > { %v395_v19 = vpop.xlane.xlu0 %394 }
 0x216   : > { %v465_v20 = vpop.xlane.xlu1 %464  ;;  %vm396_vm14 = vcmp.eq.f32.partialorder %v393_v56, %v395_v19  ;;  %v401_v46 = vcvt.f32.s32 %v395_v19 }
 0x217   : > { %vm466_vm15 = vcmp.eq.f32.partialorder %v463_v57, %v465_v20  ;;  %v397_v23 = vsel %vm396_vm14, %v392_v21, inf  ;;  %v471_v50 = vcvt.f32.s32 %v465_v20 }
 0x218   : > { %v467_v24 = vsel %vm466_vm15, %v462_v22, inf  ;;  %398 = vmin.xlane.f32.xlu0 %v397_v23  ;;  %v402_v55 = vshll.u32 %v401_v46, 16 }
 0x219   : > { %468 = vmin.xlane.f32.xlu1 %v467_v24  ;;  %v451_v25 = vpop.xlane.xlu0 %450  ;;  %v472_v58 = vshll.u32 %v471_v50, 16 }
 0x21a   : > { %vm452_vm0 = vcmp.eq.f32.partialorder %v449_v59, %v451_v25  ;;  %v457_v59 = vcvt.f32.s32 %v451_v25 }
 0x21b   : > { %v453_v27 = vsel %vm452_vm0, %v448_v26, inf }
 0x21c   : > { %454 = vmin.xlane.f32.xlu0 %v453_v27  ;;  %v458_v1 = vshll.u32 %v457_v59, 16 }
 0x299   : > { %v385_v30 = vpop.xlane.xlu1 %384 }
 0x29a   : > { %v386_v33 = vcvt.f32.s32 %v385_v30 }
 0x29c   : > { %v389_v34 = vadd.s32 %v388_v31, %v386_v33 }
 0x29d   : > { %v371_v37 = vpop.xlane.xlu0 %370  ;;  %v441_v38 = vpop.xlane.xlu1 %440 }
 0x29e   : > { %476 = vst.msk [vmem:[%s655_s25 + $0x8] sm:$0xff] %vm474_vm1, %v389_v34  ;;  %v372_v41 = vcvt.f32.s32 %v371_v37  ;;  %v442_v42 = vcvt.f32.s32 %v441_v38 }
 0x2a0   : > { %v375_v43 = vadd.s32 %v374_v35, %v372_v41  ;;  %v445_v44 = vadd.s32 %v444_v39, %v442_v42 }
 0x2a1   : > { %v427_v47 = vpop.xlane.xlu0 %426  ;;  %v413_v48 = vpop.xlane.xlu1 %412 }
 0x2a2   : > { %475 = vst.msk [vmem:[%s655_s25] sm:$0xff] %vm474_vm1, %v375_v43  ;;  %480 = vst.msk [vmem:[%s655_s25 + $0x28] sm:$0xff] %vm474_vm1, %v445_v44  ;;  %v428_v51 = vcvt.f32.s32 %v427_v47  ;;  %v414_v52 = vcvt.f32.s32 %v413_v48 }
 0x2a4   : > { %v431_v53 = vadd.s32 %v430_v45, %v428_v51  ;;  %v417_v54 = vadd.s32 %v416_v49, %v414_v52 }
 0x2a5   : > { %v399_v56 = vpop.xlane.xlu0 %398 }
 0x2a6   : > { %v469_v57 = vpop.xlane.xlu1 %468  ;;  %479 = vst.msk [vmem:[%s655_s25 + $0x20] sm:$0xff] %vm474_vm1, %v431_v53  ;;  %478 = vst.msk [vmem:[%s655_s25 + $0x18] sm:$0xff] %vm474_vm1, %v417_v54  ;;  %v400_v60 = vcvt.f32.s32 %v399_v56 }
 0x2a7   : > { %v470_v61 = vcvt.f32.s32 %v469_v57 }
 0x2a8   : > { %v403_v62 = vadd.s32 %v402_v55, %v400_v60 }
 0x2a9   : > { %v473_v63 = vadd.s32 %v472_v58, %v470_v61  ;;  %v455_v0 = vpop.xlane.xlu0 %454 }
 0x2aa   : > { %477 = vst.msk [vmem:[%s655_s25 + $0x10] sm:$0xff] %vm474_vm1, %v403_v62  ;;  %v456_v2 = vcvt.f32.s32 %v455_v0 }
 0x2ab   : > { %482 = vst.msk [vmem:[%s655_s25 + $0x38] sm:$0xff] %vm474_vm1, %v473_v63 }
 0x2ac   : > { %v459_v3 = vadd.s32 %v458_v1, %v456_v2 }
 0x2ae   : > { %481 = vst.msk [vmem:[%s655_s25 + $0x30] sm:$0xff] %vm474_vm1, %v459_v3 }
 0x2af PF: > { %s13_s12 = sadd.s32 1, %s598_s12  }
 0x2b0   : > { %p10_p4 = scmp.ge.s32.totalorder %s13_s12, 4  }
 0x2b2   :  { %12 = sbr.rel (!%p10_p4) target bundleno = 1 (0x1), region = 62 }

</bundles_post_ra>
